<compile_context>
chip_gen: v5e
topology: v5e:2x2
jax: 0.10.0
libtpu: 0.0.40
codegen_flags: <defaults>
</compile_context>

<pallas_src>
import jax
import jax.numpy as jnp
from jax.experimental import pallas as pl
from jax.experimental.pallas import tpu as pltpu

EPS = 1e-5  # PyTorch nn.GroupNorm default eps


def _vmem_budget(itemsize):
    """Per-block byte target + scoped-VMEM limit, derived from the chip."""
    try:
        vmem = int(pltpu.get_tpu_info().vmem_capacity_bytes)
    except Exception:
        vmem = 64 * 1024 * 1024  # assume v7x (smallest per-TC VMEM) if unknown
    # Working set per step ~= 2x double-buffered input + 2x output blocks plus
    # ~3 block-sized f32 temporaries (upcast, squares, expanded scale/shift).
    block_budget = min(max(vmem // 16, 512 * 1024), 16 * 1024 * 1024)
    if itemsize < 4:
        block_budget //= 2  # f32 temporaries are 2x the native block for bf16
    vmem_limit = min((vmem * 3) // 4, 64 * 1024 * 1024)
    return block_budget, vmem_limit


def _pick_row_tile(rows_per_image, rows_per_group, n_images, row_bytes,
                   block_budget, itemsize, min_steps=8):
    """Largest row tile that fits the budget, keeps >= min_steps grid steps,
    divides the per-image row count (so blocks never straddle a group or an
    image) and is sublane-aligned."""
    total_rows = n_images * rows_per_image
    cands = [d for d in range(rows_per_group, rows_per_image + 1, rows_per_group)
             if rows_per_image % d == 0]
    fits = [d for d in cands if d * row_bytes <= block_budget]
    if not fits:
        # TODO(synk): a single group exceeds the block budget (huge H*W); tile
        # the lane axis with sum/sumsq VMEM accumulators instead of one block.
        return rows_per_group
    pack = {4: 8, 2: 16, 1: 32}.get(itemsize, 8)
    for steps_needed in (min_steps, 2, 1):
        ok = [d for d in fits if total_rows // d >= steps_needed]
        if not ok:
            continue
        for align in (pack, 8, 1):
            aligned = [d for d in ok if d % align == 0]
            if aligned:
                return max(aligned)
    return min(fits)


def groupnorm_pallas(x, weight, bias, num_groups=32, eps=EPS, out_dtype=None):
    """GroupNorm(num_groups, C) over NCHW input x; affine params of shape (C,)."""
    N, C, H, W = x.shape
    G = num_groups
    assert C % G == 0, "channels must be divisible by num_groups"
    Cg = C // G
    HW = H * W
    out_dtype = x.dtype if out_dtype is None else jnp.dtype(out_dtype)
    itemsize = x.dtype.itemsize

    # Fold factor: smallest divisor of Cg that makes the lane dim a multiple of
    # 128 (unmasked stores).  fold=1 (pure channel rows) if none works.
    fold = 1
    for d in range(1, Cg + 1):
        if Cg % d == 0 and (d * HW) % 128 == 0:
            fold = d
            break

    L = fold * HW                    # lanes per row
    rows_per_image = C // fold       # rows per batch element
    rows_per_group = Cg // fold      # rows per normalization group
    total_rows = N * rows_per_image

    # Pure views; no extra HBM traffic.
    x2 = x.reshape(total_rows, L)
    # Merged, f32, VMEM-resident params: rows [0, rpi) = weight, [rpi, 2rpi) = bias.
    p2 = jnp.concatenate(
        [weight.astype(jnp.float32).reshape(rows_per_image, fold),
         bias.astype(jnp.float32).reshape(rows_per_image, fold)], axis=0)

    block_budget, vmem_limit = _vmem_budget(itemsize)
    row_bytes = L * itemsize
    Rt = _pick_row_tile(rows_per_image, rows_per_group, N, row_bytes,
                        block_budget, itemsize)
    blocks_per_image = rows_per_image // Rt
    num_blocks = total_rows // Rt

    def kernel(p_ref, x_ref, o_ref):
        rt, lanes = x_ref.shape
        x_nat = x_ref[...]
        xf = x_nat.astype(jnp.float32)

        # Per-row (lane-axis) partial sums, accumulated in f32.
        s1 = jnp.sum(xf, axis=1, keepdims=True)          # (rt, 1)
        s2 = jnp.sum(xf * xf, axis=1, keepdims=True)     # (rt, 1)

        inv_cnt = 1.0 / float(rows_per_group * lanes)    # = 1 / (Cg * H * W)
        if rows_per_group > 1:
            # Tiny per-group reduce over the (rt, 1) sums, then broadcast back.
            ng = rt // rows_per_group
            g1 = jnp.sum(s1.reshape(ng, rows_per_group), axis=1, keepdims=True)
            g2 = jnp.sum(s2.reshape(ng, rows_per_group), axis=1, keepdims=True)
            mean_g = g1 * inv_cnt
            var_g = g2 * inv_cnt - mean_g * mean_g
            inv_g = jax.lax.rsqrt(var_g + eps)            # EUP
            mean = jnp.broadcast_to(mean_g[:, None, :],
                                    (ng, rows_per_group, 1)).reshape(rt, 1)
            inv = jnp.broadcast_to(inv_g[:, None, :],
                                   (ng, rows_per_group, 1)).reshape(rt, 1)
        else:
            mean = s1 * inv_cnt
            var = s2 * inv_cnt - mean * mean
            inv = jax.lax.rsqrt(var + eps)                # EUP

        # Per-channel affine from the resident f32 param block.
        if blocks_per_image > 1:
            blk = pl.program_id(0) % blocks_per_image
            row0 = pl.multiple_of(blk * rt, rt)
        else:
            row0 = 0
        w = p_ref[pl.ds(row0, rt), :]                     # (rt, fold) f32
        b = p_ref[pl.ds(row0 + rows_per_image, rt), :]
        scale_rf = inv * w                                # fused per-channel scale
        shift_rf = b - mean * scale_rf                    # fused per-channel shift

        dt = o_ref.dtype
        scale_rf = scale_rf.astype(dt)
        shift_rf = shift_rf.astype(dt)
        if fold == 1:
            # Scale/shift are per-row; lane broadcast is free on the VPU.
            o_ref[...] = (x_nat * scale_rf + shift_rf).astype(dt)
        else:
            # Expand the (rt, fold) affine to the periodic lane pattern
            # (period = HW) with fold-1 selects; tiny for the usual fold <= 4.
            lane_fold = jax.lax.broadcasted_iota(jnp.int32, (rt, lanes), 1) // HW
            scale = jnp.broadcast_to(scale_rf[:, 0:1], (rt, lanes))
            shift = jnp.broadcast_to(shift_rf[:, 0:1], (rt, lanes))
            for f in range(1, fold):
                m = lane_fold == f
                scale = jnp.where(m, scale_rf[:, f:f + 1], scale)
                shift = jnp.where(m, shift_rf[:, f:f + 1], shift)
            o_ref[...] = (x_nat * scale + shift).astype(dt)

    cost = pl.CostEstimate(
        flops=6 * N * C * HW,
        transcendentals=N * G,
        bytes_accessed=N * C * HW * (itemsize + out_dtype.itemsize) + p2.size * 4,
    )

    out2 = pl.pallas_call(
        kernel,
        out_shape=jax.ShapeDtypeStruct((total_rows, L), out_dtype),
        grid=(num_blocks,),
        in_specs=[
            # Full params, constant index_map -> fetched once, stays resident.
            pl.BlockSpec((2 * rows_per_image, fold), lambda s: (0, 0)),
            pl.BlockSpec((Rt, L), lambda s: (s, 0)),
        ],
        out_specs=pl.BlockSpec((Rt, L), lambda s: (s, 0)),
        compiler_params=pltpu.CompilerParams(
            dimension_semantics=("parallel",),
            vmem_limit_bytes=vmem_limit,
        ),
        cost_estimate=cost,
    )(p2, x2)

    return out2.reshape(N, C, H, W)


def pre_norm(x, weight, bias, fn=lambda y: y, num_groups=32, out_dtype=None):
    """PreNorm.forward: x = GroupNorm(32, dim)(x); return fn(x)."""
    # TODO(synk): for a known `fn`, fuse GroupNorm as the prologue of fn's first
    # kernel (or emit bf16 via out_dtype) to save an HBM round trip.
    return fn(groupnorm_pallas(x, weight, bias, num_groups=num_groups,
                               out_dtype=out_dtype))


def _groupnorm_ref(x, weight, bias, num_groups=32):
    N, C, H, W = x.shape
    G = num_groups
    xg = x.reshape(N, G, -1).astype(jnp.float32)
    mean = xg.mean(-1, keepdims=True)
    var = ((xg - mean) ** 2).mean(-1, keepdims=True)
    xhat = ((xg - mean) / jnp.sqrt(var + EPS)).reshape(N, C, H, W)
    return (xhat * weight.reshape(1, C, 1, 1) + bias.reshape(1, C, 1, 1)).astype(x.dtype)


if __name__ == "__main__":
    key = jax.random.PRNGKey(0)
    kx, kw, kb = jax.random.split(key, 3)

    # dim must be divisible by 32 for GroupNorm(32, dim).
    C = 64
    weight = 1.0 + 0.1 * jax.random.normal(kw, (C,), dtype=jnp.float32)
    bias = 0.1 * jax.random.normal(kb, (C,), dtype=jnp.float32)

    # Two spatial sizes: 16x16 (HW=256) exercises the lane-dense fold=1 path,
    # 8x8 (HW=64) exercises the fold-channels-into-lanes path (Cg*HW = 128).
    for (N, H, W) in [(2, 16, 16), (2, 8, 8)]:
        x = jax.random.normal(kx, (N, C, H, W), dtype=jnp.float32) + 0.5
        out = pre_norm(x, weight, bias, fn=lambda y: y)
        out = jax.block_until_ready(out)
        ref = _groupnorm_ref(x, weight, bias)
        assert out.shape == (N, C, H, W)
        assert jnp.allclose(out, ref, atol=1e-4, rtol=1e-4), \
            f"mismatch vs reference at shape {(N, C, H, W)}"

    print("KERNEL_OK")
</pallas_src>

<mosaic_0001>
module attributes {stable_mosaic.version = 11 : i64} {
  func.func @kernel(%arg0: i32, %arg1: memref<128x1xf32, #tpu.memory_space<vmem>>, %arg2: memref<16x256xf32, #tpu.memory_space<vmem>>, %arg3: memref<16x256xf32, #tpu.memory_space<vmem>>) attributes {dimension_semantics = [#tpu.dimension_semantics<parallel>], iteration_bounds = array<i64: 8>, scalar_prefetch = 0 : i64, scratch_operands = 0 : i64, tpu.core_type = #tpu.core_type<tc>, window_params = [{pipeline_mode = #tpu.pipeline_mode<synchronous>, transform_indices = @transform_0, window_bounds = array<i64: 128, 1>}, {transform_indices = @transform_1, window_bounds = array<i64: 16, 256>}, {transform_indices = @transform_2, window_bounds = array<i64: 16, 256>}]} {
    %c0 = arith.constant 0 : index
    %c0_0 = arith.constant 0 : index
    %0 = vector.load %arg2[%c0, %c0_0] : memref<16x256xf32, #tpu.memory_space<vmem>>, vector<16x256xf32>
    %cst = arith.constant dense<0.000000e+00> : vector<16xf32>
    %1 = vector.multi_reduction <add>, %0, %cst [1] : vector<16x256xf32> to vector<16xf32>
    %2 = vector.shape_cast %1 : vector<16xf32> to vector<16x1xf32>
    %3 = arith.mulf %0, %0 : vector<16x256xf32>
    %cst_1 = arith.constant dense<0.000000e+00> : vector<16xf32>
    %4 = vector.multi_reduction <add>, %3, %cst_1 [1] : vector<16x256xf32> to vector<16xf32>
    %5 = vector.shape_cast %4 : vector<16xf32> to vector<16x1xf32>
    %6 = vector.shape_cast %2 : vector<16x1xf32> to vector<8x2xf32>
    %cst_2 = arith.constant dense<0.000000e+00> : vector<8xf32>
    %7 = vector.multi_reduction <add>, %6, %cst_2 [1] : vector<8x2xf32> to vector<8xf32>
    %8 = vector.shape_cast %7 : vector<8xf32> to vector<8x1xf32>
    %9 = vector.shape_cast %5 : vector<16x1xf32> to vector<8x2xf32>
    %cst_3 = arith.constant dense<0.000000e+00> : vector<8xf32>
    %10 = vector.multi_reduction <add>, %9, %cst_3 [1] : vector<8x2xf32> to vector<8xf32>
    %11 = vector.shape_cast %10 : vector<8xf32> to vector<8x1xf32>
    %cst_4 = arith.constant 0.001953125 : f32
    %12 = vector.broadcast %cst_4 : f32 to vector<8x1xf32>
    %13 = arith.mulf %8, %12 : vector<8x1xf32>
    %cst_5 = arith.constant 0.001953125 : f32
    %14 = vector.broadcast %cst_5 : f32 to vector<8x1xf32>
    %15 = arith.mulf %11, %14 : vector<8x1xf32>
    %16 = arith.mulf %13, %13 : vector<8x1xf32>
    %17 = arith.subf %15, %16 : vector<8x1xf32>
    %cst_6 = arith.constant 9.99999974E-6 : f32
    %18 = vector.broadcast %cst_6 : f32 to vector<8x1xf32>
    %19 = arith.addf %17, %18 : vector<8x1xf32>
    %20 = math.rsqrt %19 : vector<8x1xf32>
    %21 = vector.shape_cast %13 : vector<8x1xf32> to vector<8x1x1xf32>
    %22 = vector.shape_cast %21 : vector<8x1x1xf32> to vector<8x1x1xf32>
    %23 = vector.broadcast %22 : vector<8x1x1xf32> to vector<8x2x1xf32>
    %24 = vector.shape_cast %23 : vector<8x2x1xf32> to vector<16x1xf32>
    %25 = vector.shape_cast %20 : vector<8x1xf32> to vector<8x1x1xf32>
    %26 = vector.shape_cast %25 : vector<8x1x1xf32> to vector<8x1x1xf32>
    %27 = vector.broadcast %26 : vector<8x1x1xf32> to vector<8x2x1xf32>
    %28 = vector.shape_cast %27 : vector<8x2x1xf32> to vector<16x1xf32>
    %c4_i32 = arith.constant 4 : i32
    %c0_i32 = arith.constant 0 : i32
    %29 = arith.cmpi eq, %c4_i32, %c0_i32 : i32
    %c1_i32 = arith.constant 1 : i32
    %30 = arith.select %29, %c1_i32, %c4_i32 : i32
    %31 = arith.remsi %arg0, %30 : i32
    %c0_i32_7 = arith.constant 0 : i32
    %32 = arith.cmpi ne, %31, %c0_i32_7 : i32
    %c0_i32_8 = arith.constant 0 : i32
    %33 = arith.cmpi slt, %31, %c0_i32_8 : i32
    %c0_i32_9 = arith.constant 0 : i32
    %34 = arith.cmpi slt, %30, %c0_i32_9 : i32
    %35 = arith.xori %33, %34 : i1
    %36 = arith.andi %35, %32 : i1
    %37 = arith.addi %31, %30 : i32
    %38 = arith.select %36, %37, %31 : i32
    %c16_i32 = arith.constant 16 : i32
    %39 = arith.muli %38, %c16_i32 : i32
    %40 = tpu.assume_multiple %39, 16 : i32
    %41 = arith.index_cast %40 : i32 to index
    %c0_10 = arith.constant 0 : index
    %42 = vector.load %arg1[%41, %c0_10] : memref<128x1xf32, #tpu.memory_space<vmem>>, vector<16x1xf32>
    %c64_i32 = arith.constant 64 : i32
    %43 = arith.addi %40, %c64_i32 : i32
    %44 = arith.index_cast %43 : i32 to index
    %c0_11 = arith.constant 0 : index
    %45 = vector.load %arg1[%44, %c0_11] : memref<128x1xf32, #tpu.memory_space<vmem>>, vector<16x1xf32>
    %46 = arith.mulf %28, %42 : vector<16x1xf32>
    %47 = arith.mulf %24, %46 : vector<16x1xf32>
    %48 = arith.subf %45, %47 : vector<16x1xf32>
    %49 = vector.broadcast %46 : vector<16x1xf32> to vector<16x256xf32>
    %50 = arith.mulf %0, %49 : vector<16x256xf32>
    %51 = vector.broadcast %48 : vector<16x1xf32> to vector<16x256xf32>
    %52 = arith.addf %50, %51 : vector<16x256xf32>
    %c0_12 = arith.constant 0 : index
    %c0_13 = arith.constant 0 : index
    %53 = vector.load %arg3[%c0_12, %c0_13] : memref<16x256xf32, #tpu.memory_space<vmem>>, vector<16x256xf32>
    tpu.vector_store %arg3[%c0_12, %c0_13], %52 {strides = array<i32>} : memref<16x256xf32, #tpu.memory_space<vmem>>, vector<16x256xf32>,
    return
  }
  func.func @transform_0(%arg0: i32) -> (i32, i32) {
    %c0_i32 = arith.constant 0 : i32
    %c0_i32_0 = arith.constant 0 : i32
    %c0_i32_1 = arith.constant 0 : i32
    return %c0_i32, %c0_i32_0 : i32, i32
  }
  func.func @transform_1(%arg0: i32) -> (i32, i32) {
    %c0_i32 = arith.constant 0 : i32
    %c0_i32_0 = arith.constant 0 : i32
    return %arg0, %c0_i32 : i32, i32
  }
  func.func @transform_2(%arg0: i32) -> (i32, i32) {
    %c0_i32 = arith.constant 0 : i32
    %c0_i32_0 = arith.constant 0 : i32
    return %arg0, %c0_i32 : i32, i32
  }
}

</mosaic_0001>

<bundles_post_ra>
// kernel: tpu_custom_call.1
= control target key start
LH: loop header
LB: loop body
LE: loop exit
PB: predicated region body
PF: predicated region fallthrough
CT: control target
= control target key end

     0   :  { %7 = vsyncpa [#allocation3], 0  ;;  %s1149_s0 = inlined_call_operand.vmem [shape: f32[128,1], index: 0, kind: input, shape index: {}]   ;;  %s1150_s1 = inlined_call_operand.hbm [shape: f32[128,256], index: 1, kind: input, shape index: {}]   ;;  %s1151_s2 = inlined_call_operand.hbm [shape: f32[128,256], index: 2, kind: output, shape index: {}]  }
   0x1   :  { %9 = vsyncpa [#allocation3 + $0x1], 0 }
   0x2   :  { %10 = vsyncpa [#allocation4], 0 }
   0x3   :  { %12 = vsyncpa [#allocation4 + $0x1], 0  ;;  %s942_s9 = smov 0   ;;  %s944_s10 = smov 0  }
   0x4   :  { %s946_s11 = smov 0   ;;  %s948_s12 = smov 0  }
   0x5 LB: > { %s963_s13 = sadd.s32 4294967295, %s916_s12   ;;  %s733_s14 = sadd.s32 4294967294, %s916_s12   ;;  %s916_s12 = sphi %s948_s12, %s1160_s12   ;;  %s912_s11 = sphi %s946_s11, %s1159_s11   ;;  %s908_s10 = sphi %s944_s10, %s1158_s10   ;;  %s904_s9 = sphi %s942_s9, %s1157_s9  }
   0x6   : > { %s967_s15 = sadd.s32 1, %s916_s12   ;;  %s46_s16 = sadd.s32 1, %s912_s11 }
   0x7   : > { %s43_s17 = ssub.s32 %s916_s12, %s967_s15  ;;  %p53_p0 = scmp.ne.s32.totalorder %s912_s11, %s908_s10 }
   0x8   : > { %p44_p1 = scmp.eq.s32.totalorder %s43_s17, 0  ;;  %p54_p2 = scmp.eq.s32.totalorder %s916_s12, 0 }
   0x9   : > { %p59_p3 = scmp.ne.s32.totalorder %s908_s10, %s904_s9  ;;  %p60_p4 = scmp.eq.s32.totalorder %s963_s13, 0 }
   0xa   : > { %s979_s18 = scalar_select %p44_p1, %s912_s11, %s46_s16  }
   0xb   : > { %p981_p5 = por %p54_p2, %p53_p0  ;;  %p985_p6 = por %p60_p4, %p59_p3 }
   0xc   : > { %p83_p7 = scmp.eq.s32.totalorder %s963_s13, 7  ;;  %p89_p8 = scmp.eq.s32.totalorder %s733_s14, 7 }
   0xd   : > { %p772_p9 = scmp.lt.s32.totalorder %s916_s12, 8  ;;  %s112_s23 = sand.u32 1, %s912_s11  }
   0xe   : > { %p991_p10 = por %p83_p7, %p53_p0  ;;  %p995_p11 = por %p89_p8, %p59_p3 }
   0xf   : > { %s757_s24 = sshll.u32 %s916_s12, 5  ;;  %s736_s25 = sshll.u32 %s112_s23, 5 }
  0x10   : > { %s122_s28 = scalar_lea.hbm %s1150_s1, %s757_s24  ;;  %s116_s30 = scalar_lea.vmem [#allocation2], %s736_s25 }
  0x11   : > { %s123_s29 = sshll.u32 %s122_s28, 4  ;;  %s125_s3 = sshll.u32 %s116_s30, 4  ;;  %s124_s29 = int_to_ptr.hbm [resolvable:$true] %s123_s29  ;;  %s126_s3 = int_to_ptr.vmem [resolvable:$true] %s125_s3 }
  0x12   : > { %p1006_p12 = pnand %p772_p9, %p981_p5  ;;  %p740_p13 = scmp.ge.s32.totalorder %s916_s12, 1 }
  0x13   : > { %p133_p0 = scmp.lt.s32.totalorder %s916_s12, 9  ;;  %s113_s5 = scalar_lea.sflag [#allocation3], %s112_s23 }
  0x14   : > { %s820_s6 = sshra.s32 %s124_s29, 4  ;;  %p824_p2 = pneg %p1006_p12  ;;  %s821_s6 = int_to_ptr.hbm [resolvable:$true] %s820_s6 }
  0x15   : > { %s822_s7 = scalar_lea.hbm %s821_s6, 32  ;;  %s827_s16 = scalar_lea.hbm %s1150_s1, 256 }
  0x16   : > { %p823_p1 = scmp.ne.s32.totalorder %s821_s6, %s822_s7  ;;  %p828_p5 = scmp.lt.s32.totalorder %s821_s6, %s1150_s1 }
  0x17   : > { %p829_p7 = scmp.lt.s32.totalorder %s827_s16, %s822_s7 }
  0x18   : > { %p825_p3 = pnand %p824_p2, %p823_p1 }
  0x19   : > { %p830_p8 = por %p829_p7, %p828_p5 }
  0x1a   : > { %p826_p4 = pneg %p825_p3 }
  0x1c   : > { %p831_p9 = pnand %p830_p8, %p826_p4 }
  0x1e   : > { %834 = shalt.err (!%p831_p9)
}
  0x1f   : > { %s918_s23 = smov 256   ;;  %s919_s24 = smov 16  }
  0x20   : > { %767 = dma.hbm_to_vmem [thread:$0]  (!%p1006_p12), %s124_s29, 512, %s126_s3, %s113_s5, %s918_s23, %s918_s23, %s919_s24  }
  0x21   : > { %p134_p1 = pnand %p740_p13, %p133_p0 }
  0x22   : > { %s1027_s25 = sand.u32 (!%p134_p1), 1, %s908_s10  }
  0x23   : > { %137 = sbr.rel (%p134_p1) target bundleno = 645 (0x285), region = 28  ;;  %s741_s26 = sshll.u32 (!%p134_p1), %s1027_s25, 5 }
  0x24   : > { %s140_s27 = scalar_lea.sflag (!%p134_p1), [#allocation3], %s1027_s25  ;;  %s143_s28 = scalar_lea.vmem (!%p134_p1), [#allocation2], %s741_s26 }
  0x28   : > { %895 = dma.done.wait (%p985_p6), %s140_s27, 512  }
  0x29   : > { %897 = vsyncadd (%p985_p6), %s140_s27, 4294966784  ;;  %v1037_v0 = vld [vmem:[%s143_s28] sm:$0xff]  ;;  %v1039_v1 = vld [vmem:[%s143_s28 + $0x8] sm:$0xff]  ;;  %v920_v12 = vmov 0   ;;  %v921_v13 = vmov 269488144  }
  0x2a   : > { %v171_v2 = vadd.f32 %v1039_v1, %v1037_v0  ;;  %v177_v3 = vmul.f32 %v1037_v0, %v1037_v0  ;;  %v178_v4 = vmul.f32 %v1039_v1, %v1039_v1  ;;  %v1047_v6 = vld [vmem:[%s143_s28 + $0x10] sm:$0xff]  ;;  %v1049_v7 = vld [vmem:[%s143_s28 + $0x18] sm:$0xff]  ;;  %815 = vset.pattern.permute.xlu2 %v920_v12  ;;  %817 = vset.pattern.permute.xlu1 %v920_v12  ;;  %v190_v14 = vunpack.c.l.s4 %v921_v13  ;;  %s435_s20 = ssub.s32 0, %s963_s13  ;;  %p434_p6 = scmp.lt.s32.totalorder %s963_s13, 0 }
  0x2b   : > { %v179_v8 = vmul.f32 %v1047_v6, %v1047_v6  ;;  %v180_v9 = vmul.f32 %v1049_v7, %v1049_v7  ;;  %v174_v10 = vadd.f32 %v1049_v7, %v1047_v6  ;;  %816 = vset.pattern.permute.xlu0 %v920_v12  ;;  %v922_v15 = vmov 842150450   ;;  %s743_s29 = smin.u32 %s963_s13, %s435_s20  ;;  %s759_s14 = sshll.u32 %s963_s13, 5 }
  0x2c   : > { %172 = vadd.xlane.f32.xlu0 %v171_v2  ;;  %v181_v5 = vadd.f32 %v178_v4, %v177_v3  ;;  %v194_v16 = vunpack.c.l.s4 %v922_v15  ;;  %v1057_v17 = vunpack.c.0.s8 %v190_v14  ;;  %v923_v20 = vmov 1414812756   ;;  %s437_s30 = sand.u32 3, %s743_s29   ;;  %s164_s16 = scalar_lea.vmem [#allocation5], %s741_s26 }
  0x2d   : > { %v184_v11 = vadd.f32 %v180_v9, %v179_v8  ;;  %v198_v21 = vunpack.c.l.s4 %v923_v20  ;;  %v924_v24 = vmov 1987475062   ;;  %v262_v3 = vlaneseq  ;;  %s438_s3 = ssub.s32 0, %s437_s30  ;;  %s651_s23 = scalar_lea.hbm %s1151_s2, %s759_s14 }
  0x2e   : > { %182 = vadd.xlane.f32.xlu1 %v181_v5  ;;  %v195_v18 = vunpack.c.0.s8 %v194_v16  ;;  %v202_v25 = vunpack.c.l.s4 %v924_v24  ;;  %vm272_vm0 = vcmask 1041409   ;;  %vm274_vm1 = vcmask 1042434   ;;  %s1162_s3 = smov (!%p434_p6, %s438_s3), %s437_s30  ;;  %s652_s24 = sshll.u32 %s164_s16, 4  ;;  %s653_s24 = int_to_ptr.vmem [resolvable:$true] %s652_s24 }
  0x2f   : > { %v199_v26 = vunpack.c.0.s8 %v198_v21  ;;  %v263_v5 = vand.u32 127, %v262_v3  ;;  %vm276_vm2 = vcmask 1043459   ;;  %vm278_vm3 = vcmask 1044484   ;;  %p745_p12 = scmp.lt.s32.totalorder %s1162_s3, 0  ;;  %s444_s4 = sadd.s32 4, %s1162_s3 }
  0x30   : > { %v203_v27 = vunpack.c.0.s8 %v202_v25  ;;  %vm280_vm4 = vcmask 1045509   ;;  %vm282_vm5 = vcmask 1046534   ;;  %vm284_vm6 = vcmask 1047559   ;;  %s654_s27 = sshll.u32 %s651_s23, 4  ;;  %s639_s13 = scalar_lea.sflag [#allocation4], %s1027_s25  ;;  %s655_s27 = int_to_ptr.hbm [resolvable:$true] %s654_s27 }
  0x31   : > { %vm287_vm7 = vcmask 15360   ;;  %s1164_s4 = smov (!%p745_p12, %s444_s4), %s1162_s3  ;;  %s864_s26 = sshra.s32 %s655_s27, 4  ;;  %s865_s26 = int_to_ptr.hbm [resolvable:$true] %s864_s26 }
  0x32   : > { %s746_s5 = sshll.u32 %s1164_s4, 4  ;;  %s866_s28 = scalar_lea.hbm %s865_s26, 32 }
  0x33   : > { %s1089_s8 = scalar_lea.vmem %s1149_s0, %s746_s5  ;;  %p867_p13 = scmp.ne.s32.totalorder %s865_s26, %s866_s28 }
  0x34   : > { %175 = vadd.xlane.f32.xlu0 %v174_v10  ;;  %v448_v3 = vld [vmem:[%s1089_s8] sm:$0xff]  ;;  %s870_s30 = scalar_lea.hbm %s1151_s2, 256  ;;  %p871_p3 = scmp.lt.s32.totalorder %s865_s26, %s1151_s2 }
  0x35   : > { %p868_p0 = pnand %p867_p13, %p991_p10  ;;  %p872_p4 = scmp.lt.s32.totalorder %s870_s30, %s866_s28 }
  0x36   : > { %185 = vadd.xlane.f32.xlu1 %v184_v11 }
  0x37   : > { %p869_p2 = pneg %p868_p0  ;;  %p873_p5 = por %p872_p4, %p871_p3 }
  0x39   : > { %p874_p7 = pnand %p873_p5, %p869_p2 }
  0x9f   : > { %v173_v19 = vpop.xlane.xlu0 %172 }
  0xa0   : > { %v192_v22 = vperm.slane %v173_v19, %v1057_v17  ;;  %v196_v23 = vperm.slane %v173_v19, %v195_v18  ;;  %v200_v28 = vperm.slane %v173_v19, %v199_v26  ;;  %v204_v29 = vperm.slane %v173_v19, %v203_v27 }
  0xa1   : > { %v183_v41 = vpop.xlane.xlu1 %182 }
  0xa2   : > { %221 = vst [vmem:[#allocation1] ss:$4 sm:$0xff] %v192_v22  ;;  %v296_v42 = vperm.slane %v183_v41, %v1057_v17  ;;  %v300_v43 = vperm.slane %v183_v41, %v195_v18  ;;  %v304_v46 = vperm.slane %v183_v41, %v199_v26  ;;  %v308_v47 = vperm.slane %v183_v41, %v203_v27 }
  0xa3   : > { %224 = vst [vmem:[#allocation1 + $0x20] ss:$4 sm:$0xff] %v196_v23 }
  0xa7   : > { %v176_v32 = vpop.xlane.xlu0 %175 }
  0xa8   : > { %v208_v33 = vperm.slane %v176_v32, %v1057_v17  ;;  %v212_v34 = vperm.slane %v176_v32, %v195_v18  ;;  %v216_v37 = vperm.slane %v176_v32, %v199_v26  ;;  %v220_v38 = vperm.slane %v176_v32, %v203_v27 }
  0xa9   : > { %v222_v30 = vld.sshfl [vmem:[#allocation1] sm:$0xff pattern:$0x73625140]  ;;  %v186_v50 = vpop.xlane.xlu1 %185 }
  0xaa   : > { %v225_v31 = vld.sshfl [vmem:[#allocation1 + $0x20] sm:$0xff pattern:$0x73625140]  ;;  %226 = vst [vmem:[#allocation1] ss:$4 sm:$0xff] %v200_v28  ;;  %239 = vperm.xlu2 %815, %v222_v30   ;;  %v312_v51 = vperm.slane %v186_v50, %v1057_v17  ;;  %v316_v52 = vperm.slane %v186_v50, %v195_v18  ;;  %v320_v55 = vperm.slane %v186_v50, %v199_v26 }
  0xab   : > { %228 = vst [vmem:[#allocation1 + $0x20] ss:$4 sm:$0xff] %v204_v29  ;;  %v324_v56 = vperm.slane %v186_v50, %v203_v27 }
  0xb1   : > { %v227_v35 = vld.sshfl [vmem:[#allocation1] sm:$0xff pattern:$0x73625140] }
  0xb2   : > { %v229_v36 = vld.sshfl [vmem:[#allocation1 + $0x20] sm:$0xff pattern:$0x73625140]  ;;  %230 = vst [vmem:[#allocation1] ss:$4 sm:$0xff] %v208_v33  ;;  %242 = vperm.xlu2 %815, %v225_v31   ;;  %245 = vperm.xlu0 %816, %v227_v35  }
  0xb3   : > { %232 = vst [vmem:[#allocation1 + $0x20] ss:$4 sm:$0xff] %v212_v34  ;;  %248 = vperm.xlu1 %817, %v229_v36  }
  0xb9   : > { %v231_v39 = vld.sshfl [vmem:[#allocation1] sm:$0xff pattern:$0x73625140] }
  0xba   : > { %v233_v40 = vld.sshfl [vmem:[#allocation1 + $0x20] sm:$0xff pattern:$0x73625140]  ;;  %234 = vst [vmem:[#allocation1] ss:$4 sm:$0xff] %v216_v37  ;;  %251 = vperm.xlu2 %815, %v231_v39  }
  0xbb   : > { %236 = vst [vmem:[#allocation1 + $0x20] ss:$4 sm:$0xff] %v220_v38  ;;  %254 = vperm.xlu1 %817, %v233_v40  }
  0xc1   : > { %v235_v44 = vld.sshfl [vmem:[#allocation1] sm:$0xff pattern:$0x73625140] }
  0xc2   : > { %v237_v45 = vld.sshfl [vmem:[#allocation1 + $0x20] sm:$0xff pattern:$0x73625140]  ;;  %325 = vst [vmem:[#allocation1] ss:$4 sm:$0xff] %v296_v42 }
  0xc3   : > { %328 = vst [vmem:[#allocation1 + $0x20] ss:$4 sm:$0xff] %v300_v43  ;;  %260 = vperm.xlu2 %815, %v237_v45   ;;  %257 = vperm.xlu1 %817, %v235_v44  }
  0xc9   : > { %v326_v48 = vld.sshfl [vmem:[#allocation1] sm:$0xff pattern:$0x73625140] }
  0xca   : > { %330 = vst [vmem:[#allocation1] ss:$4 sm:$0xff] %v304_v46  ;;  %v329_v49 = vld.sshfl [vmem:[#allocation1 + $0x20] sm:$0xff pattern:$0x73625140] }
  0xcb   : > { %343 = vperm.xlu2 %815, %v326_v48   ;;  %332 = vst [vmem:[#allocation1 + $0x20] ss:$4 sm:$0xff] %v308_v47 }
  0xd1   : > { %v331_v53 = vld.sshfl [vmem:[#allocation1] sm:$0xff pattern:$0x73625140] }
  0xd2   : > { %v333_v54 = vld.sshfl [vmem:[#allocation1 + $0x20] sm:$0xff pattern:$0x73625140]  ;;  %334 = vst [vmem:[#allocation1] ss:$4 sm:$0xff] %v312_v51 }
  0xd3   : > { %346 = vperm.xlu2 %815, %v329_v49   ;;  %336 = vst [vmem:[#allocation1 + $0x20] ss:$4 sm:$0xff] %v316_v52 }
  0xd9   : > { %v335_v57 = vld.sshfl [vmem:[#allocation1] sm:$0xff pattern:$0x73625140] }
  0xda   : > { %v337_v58 = vld.sshfl [vmem:[#allocation1 + $0x20] sm:$0xff pattern:$0x73625140]  ;;  %355 = vperm.xlu0 %816, %v335_v57   ;;  %338 = vst [vmem:[#allocation1] ss:$4 sm:$0xff] %v320_v55 }
  0xdb   : > { %340 = vst [vmem:[#allocation1 + $0x20] ss:$4 sm:$0xff] %v324_v56  ;;  %358 = vperm.xlu1 %817, %v337_v58   ;;  %349 = vperm.xlu2 %815, %v331_v53  }
  0xe1   : > { %v339_v59 = vld.sshfl [vmem:[#allocation1] sm:$0xff pattern:$0x73625140] }
  0xe2   : > { %361 = vperm.xlu0 %816, %v339_v59   ;;  %v341_v60 = vld.sshfl [vmem:[#allocation1 + $0x20] sm:$0xff pattern:$0x73625140] }
  0xe3   : > { %352 = vperm.xlu2 %815, %v333_v54  }
  0xeb   : > { %364 = vperm.xlu2 %815, %v341_v60  }
 0x104   : > { %v240_v61 = vpop.permute.xlu2 %239 }
 0x105   : > { %v264_v12 = vperm.slane %v240_v61, %v263_v5 }
 0x10c   : > { %v243_v62 = vpop.permute.xlu2 %242 }
 0x10d   : > { %v265_v9 = vperm.slane %v243_v62, %v263_v5 }
 0x10f   : > { %v273_v14 = vsel %vm272_vm0, %v265_v9, %v264_v12  ;;  %v456_v12 = vrot.slane %v448_v3, 2 }
 0x114   : > { %v252_v63 = vpop.permute.xlu2 %251 }
 0x115   : > { %v268_v20 = vperm.slane %v252_v63, %v263_v5 }
 0x11d   : > { %v261_v2 = vpop.permute.xlu2 %260 }
 0x11e   : > { %v271_v25 = vperm.slane %v261_v2, %v263_v5  ;;  %v449_v2 = vld [vmem:[%s1089_s8 + $0x8] sm:$0xff] }
 0x11f   : > { %v461_v9 = vrot.slane %v449_v2, 6 }
 0x124   : > { %v246_v8 = vpop.permute.xlu0 %245 }
 0x125   : > { %v249_v4 = vpop.permute.xlu1 %248  ;;  %v344_v10 = vpop.permute.xlu2 %343  ;;  %v266_v11 = vperm.slane %v246_v8, %v263_v5 }
 0x126   : > { %v267_v15 = vperm.slane %v249_v4, %v263_v5  ;;  %v366_v35 = vperm.slane %v344_v10, %v263_v5  ;;  %v459_v10 = vrot.slane %v449_v2, 2 }
 0x127   : > { %v275_v16 = vsel %vm274_vm1, %v266_v11, %v273_v14  ;;  %v457_v14 = vrot.slane %v448_v3, 4 }
 0x128   : > { %v277_v18 = vsel %vm276_vm2, %v267_v15, %v275_v16  ;;  %v458_v15 = vrot.slane %v448_v3, 6  ;;  %v460_v16 = vrot.slane %v449_v2, 4 }
 0x129   : > { %v279_v23 = vsel %vm278_vm3, %v268_v20, %v277_v18 }
 0x12d   : > { %v255_v13 = vpop.permute.xlu1 %254  ;;  %v347_v21 = vpop.permute.xlu2 %346 }
 0x12e   : > { %v269_v19 = vperm.slane %v255_v13, %v263_v5  ;;  %v367_v32 = vperm.slane %v347_v21, %v263_v5 }
 0x130   : > { %v281_v26 = vsel %vm280_vm4, %v269_v19, %v279_v23  ;;  %v374_v39 = vsel %vm272_vm0, %v367_v32, %v366_v35 }
 0x135   : > { %v258_v22 = vpop.permute.xlu1 %257  ;;  %v350_v30 = vpop.permute.xlu2 %349 }
 0x136   : > { %v270_v24 = vperm.slane %v258_v22, %v263_v5  ;;  %v368_v34 = vperm.slane %v350_v30, %v263_v5 }
 0x138   : > { %v283_v27 = vsel %vm282_vm5, %v270_v24, %v281_v26  ;;  %v375_v40 = vsel %vm274_vm1, %v368_v34, %v374_v39 }
 0x139   : > { %v285_v28 = vsel %vm284_vm6, %v271_v25, %v283_v27 }
 0x13a   : > { %v288_v29 = vsel %vm287_vm7, %v285_v28, 0.0 }
 0x13b   : > { %289 = vadd.xlane.f32.xlu1 %v288_v29 }
 0x13d   : > { %v353_v31 = vpop.permute.xlu2 %352 }
 0x13e   : > { %v369_v36 = vperm.slane %v353_v31, %v263_v5 }
 0x140   : > { %v376_v41 = vsel %vm276_vm2, %v369_v36, %v375_v40 }
 0x145   : > { %v365_v43 = vpop.permute.xlu2 %364 }
 0x146   : > { %v373_v47 = vperm.slane %v365_v43, %v263_v5 }
 0x14c   : > { %v356_v33 = vpop.permute.xlu0 %355 }
 0x14d   : > { %v359_v37 = vpop.permute.xlu1 %358  ;;  %v370_v38 = vperm.slane %v356_v33, %v263_v5 }
 0x14e   : > { %v371_v42 = vperm.slane %v359_v37, %v263_v5 }
 0x14f   : > { %v377_v44 = vsel %vm278_vm3, %v370_v38, %v376_v41 }
 0x150   : > { %v378_v48 = vsel %vm280_vm4, %v371_v42, %v377_v44 }
 0x154   : > { %v362_v45 = vpop.permute.xlu0 %361 }
 0x155   : > { %v372_v46 = vperm.slane %v362_v45, %v263_v5 }
 0x157   : > { %v379_v49 = vsel %vm282_vm5, %v372_v46, %v378_v48 }
 0x158   : > { %v380_v50 = vsel %vm284_vm6, %v373_v47, %v379_v49  ;;  %v748_v47 = vld [vmem:[%s1089_s8 + $0x40] sm:$0xff] }
 0x159   : > { %v382_v51 = vsel %vm287_vm7, %v380_v50, 0.0  ;;  %v749_v50 = vld [vmem:[%s1089_s8 + $0x48] sm:$0xff] }
 0x15a   : > { %383 = vadd.xlane.f32.xlu0 %v382_v51 }
 0x1ae   : > { %v290_v52 = vpop.xlane.xlu1 %289 }
 0x1af   : > { %v1081_v53 = vmul.f32 0.001953125, %v290_v52 }
 0x1b1   : > { %v387_v55 = vmul.f32 %v1081_v53, %v1081_v53  ;;  %v408_v5 = vperm.slane %v1081_v53, 7  ;;  %v406_v8 = vperm.slane %v1081_v53, 5  ;;  %v401_v11 = vperm.slane %v1081_v53, 0 }
 0x1b2   : > { %v402_v30 = vperm.slane %v1081_v53, 1  ;;  %v403_v37 = vperm.slane %v1081_v53, 2  ;;  %v404_v39 = vperm.slane %v1081_v53, 3  ;;  %v405_v42 = vperm.slane %v1081_v53, 4 }
 0x1b3   : > { %v407_v44 = vperm.slane %v1081_v53, 6 }
 0x1cd   : > { %v384_v54 = vpop.xlane.xlu0 %383 }
 0x1ce   : > { %v386_v56 = vmul.f32 0.001953125, %v384_v54 }
 0x1d0   : > { %v388_v57 = vsub.f32 %v386_v56, %v387_v55 }
 0x1d2   : > { %v389_v58 = vadd.f32 1e-05, %v388_v57 }
 0x1d4   : > { %818 = vrsqrt.f32 %v389_v58  ;;  %vm396_vm9 = vweird.f32 %v389_v58 }
 0x1da   : > { %v819_v59 = vpop.eup %818 }
 0x1db   : > { %v391_v60 = vmul.f32 %v819_v59, %v389_v58  ;;  %vm397_vm8 = vweird.f32 %v819_v59 }
 0x1dc   : > { %vm398_vm10 = vmor %vm396_vm9, %vm397_vm8 }
 0x1dd   : > { %v392_v61 = vmul.f32 %v819_v59, %v391_v60 }
 0x1df   : > { %v393_v62 = vmul.f32 0.5, %v392_v61 }
 0x1e1   : > { %v394_v63 = vsub.f32 1.5, %v393_v62 }
 0x1e3   : > { %v395_v4 = vmul.f32 %v819_v59, %v394_v63 }
 0x1e5   : > { %v399_v13 = vsel %vm398_vm10, %v819_v59, %v395_v4 }
 0x1e6   : > { %v425_v18 = vperm.slane %v399_v13, 7  ;;  %v423_v19 = vperm.slane %v399_v13, 5  ;;  %v418_v20 = vperm.slane %v399_v13, 0  ;;  %v419_v21 = vperm.slane %v399_v13, 1 }
 0x1e7   : > { %v420_v22 = vperm.slane %v399_v13, 2  ;;  %v421_v23 = vperm.slane %v399_v13, 3  ;;  %v422_v24 = vperm.slane %v399_v13, 4  ;;  %v424_v25 = vperm.slane %v399_v13, 6 }
 0x1e8   : > { %v475_v26 = vmul.f32 %v461_v9, %v425_v18  ;;  %v473_v27 = vmul.f32 %v459_v10, %v423_v19  ;;  %v468_v28 = vmul.f32 %v448_v3, %v418_v20  ;;  %v469_v29 = vmul.f32 %v456_v12, %v419_v21 }
 0x1e9   : > { %v470_v31 = vmul.f32 %v457_v14, %v420_v22  ;;  %v471_v32 = vmul.f32 %v458_v15, %v421_v23  ;;  %v472_v33 = vmul.f32 %v449_v2, %v422_v24  ;;  %v474_v40 = vmul.f32 %v460_v16, %v424_v25 }
 0x1ea   : > { %578 = vperm.xlu0 %816, %v475_v26   ;;  %v483_v34 = vmul.f32 %v475_v26, %v408_v5  ;;  %560 = vperm.xlu1 %817, %v473_v27   ;;  %v481_v35 = vmul.f32 %v473_v27, %v406_v8  ;;  %v476_v36 = vmul.f32 %v468_v28, %v401_v11 }
 0x1eb   : > { %515 = vperm.xlu2 %815, %v468_v28   ;;  %v477_v38 = vmul.f32 %v469_v29, %v402_v30  ;;  %v478_v41 = vmul.f32 %v470_v31, %v403_v37  ;;  %v479_v43 = vmul.f32 %v471_v32, %v404_v39  ;;  %v480_v45 = vmul.f32 %v472_v33, %v405_v42 }
 0x1ec   : > { %506 = vst [vmem:[#allocation1 + $0x23] ss:$4 sm:$0xff] %v483_v34  ;;  %v482_v46 = vmul.f32 %v474_v40, %v407_v44 }
 0x1ed   : > { %502 = vst [vmem:[#allocation1 + $0x21] ss:$4 sm:$0xff] %v481_v35 }
 0x1ee   : > { %492 = vst [vmem:[#allocation1] ss:$4 sm:$0xff] %v476_v36 }
 0x1ef   : > { %494 = vst [vmem:[#allocation1 + $0x1] ss:$4 sm:$0xff] %v477_v38 }
 0x1f0   : > { %496 = vst [vmem:[#allocation1 + $0x2] ss:$4 sm:$0xff] %v478_v41 }
 0x1f1   : > { %498 = vst [vmem:[#allocation1 + $0x3] ss:$4 sm:$0xff] %v479_v43 }
 0x1f2   : > { %500 = vst [vmem:[#allocation1 + $0x20] ss:$4 sm:$0xff] %v480_v45 }
 0x1f3   : > { %524 = vperm.xlu2 %815, %v469_v29   ;;  %504 = vst [vmem:[#allocation1 + $0x22] ss:$4 sm:$0xff] %v482_v46 }
 0x1f8   : > { %v507_v48 = vld.sshfl [vmem:[#allocation1] sm:$0xff pattern:$0x73625140] }
 0x1f9   : > { %v511_v49 = vsub.f32 %v748_v47, %v507_v48 }
 0x1fa   : > { %v508_v51 = vld.sshfl [vmem:[#allocation1 + $0x20] sm:$0xff pattern:$0x73625140] }
 0x1fb   : > { %533 = vperm.xlu2 %815, %v470_v31   ;;  %v512_v52 = vsub.f32 %v749_v50, %v508_v51 }
 0x203   : > { %542 = vperm.xlu2 %815, %v471_v32  }
 0x20b   : > { %551 = vperm.xlu2 %815, %v472_v33  }
 0x213   : > { %569 = vperm.xlu2 %815, %v474_v40  }
 0x21b   : > { %622 = vperm.xlu2 %815, %v511_v49  }
 0x223   : > { %627 = vperm.xlu2 %815, %v512_v52  }
 0x245   : > { %v516_v53 = vpop.permute.xlu2 %515 }
 0x246   : > { %v521_v54 = vperm.slane %v516_v53, %v1057_v17 }
 0x248   : > { %593 = vst [vmem:[#allocation1] ss:$4 sm:$0xff] %v521_v54 }
 0x24d   : > { %v525_v55 = vpop.permute.xlu2 %524 }
 0x24e   : > { %v530_v56 = vperm.slane %v525_v55, %v1057_v17 }
 0x250   : > { %595 = vst [vmem:[#allocation1 + $0x1] ss:$4 sm:$0xff] %v530_v56 }
 0x255   : > { %v534_v57 = vpop.permute.xlu2 %533 }
 0x256   : > { %v539_v58 = vperm.slane %v534_v57, %v1057_v17 }
 0x258   : > { %597 = vst [vmem:[#allocation1 + $0x2] ss:$4 sm:$0xff] %v539_v58 }
 0x25c   : > { %v579_v59 = vpop.permute.xlu0 %578  ;;  %v561_v60 = vpop.permute.xlu1 %560 }
 0x25d   : > { %v584_v61 = vperm.slane %v579_v59, %v1057_v17  ;;  %v566_v62 = vperm.slane %v561_v60, %v1057_v17  ;;  %v543_v63 = vpop.permute.xlu2 %542 }
 0x25e   : > { %v548_v2 = vperm.slane %v543_v63, %v1057_v17 }
 0x25f   : > { %607 = vst [vmem:[#allocation1 + $0x23] ss:$4 sm:$0xff] %v584_v61 }
 0x260   : > { %603 = vst [vmem:[#allocation1 + $0x21] ss:$4 sm:$0xff] %v566_v62 }
 0x261   : > { %599 = vst [vmem:[#allocation1 + $0x3] ss:$4 sm:$0xff] %v548_v2 }
 0x265   : > { %v552_v3 = vpop.permute.xlu2 %551 }
 0x266   : > { %v557_v4 = vperm.slane %v552_v3, %v1057_v17 }
 0x268   : > { %601 = vst [vmem:[#allocation1 + $0x20] ss:$4 sm:$0xff] %v557_v4  ;;  %v608_v9 = vld.sshfl [vmem:[#allocation1] sm:$0xff pattern:$0x73625140] }
 0x269   : > { %v609_v10 = vld.sshfl [vmem:[#allocation1 + $0x8] sm:$0xff pattern:$0x73625140]  ;;  %v616_v11 = vmul.f32 %v608_v9, %v1037_v0 }
 0x26a   : > { %v617_v12 = vmul.f32 %v609_v10, %v1039_v1 }
 0x26d   : > { %v570_v5 = vpop.permute.xlu2 %569 }
 0x26e   : > { %v575_v8 = vperm.slane %v570_v5, %v1057_v17 }
 0x270   : > { %605 = vst [vmem:[#allocation1 + $0x22] ss:$4 sm:$0xff] %v575_v8 }
 0x275   : > { %v623_v13 = vpop.permute.xlu2 %622 }
 0x276   : > { %v630_v14 = vadd.f32 %v623_v13, %v616_v11  ;;  %v631_v15 = vadd.f32 %v623_v13, %v617_v12 }
 0x277   : > { %v610_v16 = vld.sshfl [vmem:[#allocation1 + $0x20] sm:$0xff pattern:$0x73625140]  ;;  %v611_v18 = vld.sshfl [vmem:[#allocation1 + $0x28] sm:$0xff pattern:$0x73625140] }
 0x278   : > { %634 = vst [vmem:[%s164_s16] sm:$0xff] %v630_v14  ;;  %v618_v0 = vmul.f32 %v610_v16, %v1047_v6  ;;  %v619_v1 = vmul.f32 %v611_v18, %v1049_v7 }
 0x279   : > { %635 = vst [vmem:[%s164_s16 + $0x8] sm:$0xff] %v631_v15 }
 0x27d   : > { %v628_v17 = vpop.permute.xlu2 %627 }
 0x27e   : > { %v632_v19 = vadd.f32 %v628_v17, %v618_v0  ;;  %v633_v20 = vadd.f32 %v628_v17, %v619_v1 }
 0x280   : > { %636 = vst [vmem:[%s164_s16 + $0x10] sm:$0xff] %v632_v19 }
 0x281   : > { %637 = vst [vmem:[%s164_s16 + $0x18] sm:$0xff] %v633_v20 }
 0x282   : > { %877 = shalt.err (!%p874_p7)
}
 0x283   : > { %s925_s25 = smov 256   ;;  %s926_s5 = smov 16  }
 0x284   : > { %762 = dma.vmem_to_hbm [thread:$0]  (%p991_p10), %s653_s24, 512, %s655_s27, %s639_s13, %s925_s25, %s925_s25, %s926_s5  }
 0x285 PF: > { %p773_p8 = scmp.ge.s32.totalorder %s916_s12, 2  ;;  %s669_s6 = sand.u32 1, %s904_s9  }
 0x286   : > { %s670_s7 = scalar_lea.sflag [#allocation4], %s669_s6 }
 0x287   : > { %p769_p9 = pnand %p773_p8, %p995_p11 }
 0x289   : > { %p770_p1 = pneg %p769_p9 }
 0x28b   : > { %899 = dma.done.wait (%p770_p1), %s670_s7, 512  }
 0x28c   : > { %901 = vsyncadd (%p770_p1), %s670_s7, 4294966784  ;;  %p15_p6 = scmp.ge.s32.totalorder %s967_s15, 10   ;;  %s1157_s9 = smov %s908_s10 }
 0x28d   : > { %s1158_s10 = smov %s912_s11  ;;  %s1159_s11 = smov %s979_s18 }
 0x28e   : > { %s1160_s12 = smov %s967_s15  ;;  %17 = sbr.rel (!%p15_p6) target bundleno = 5 (0x5), region = 91 }
 0x293   :  { %676 = vsyncpa [#allocation3], 1 }
 0x294   :  { %678 = vsyncpa [#allocation3 + $0x1], 1 }
 0x295   :  { %679 = vsyncpa [#allocation4], 1 }
 0x296   :  { %681 = vsyncpa [#allocation4 + $0x1], 1 }

</bundles_post_ra>
